<compile_context>
chip_gen: v7x
topology: tpu7x:2x2x1
jax: 0.10.0
libtpu: 0.0.40
codegen_flags: <defaults>
</compile_context>

<pallas_src>
import functools

import jax
import jax.numpy as jnp
from jax.experimental import pallas as pl
from jax.experimental.pallas import tpu as pltpu


_VMEM_LIMIT_BYTES = 48 * 1024 * 1024   # safe on v5e/v6e (128 MiB) and v7x (64 MiB)
_TILE_TARGET_BYTES = 4 << 20           # per-step x block target
_TILE_FLOOR_BYTES = 256 << 10          # never shrink tiles below this
_MIN_GRID_STEPS = 8                    # keep both v7x TensorCores + pipeline busy


# ----------------------------------------------------------------------------
# Kernel 1: seed threshold + separable max pool + (1 - .) + global sum
# ----------------------------------------------------------------------------
def _mask_kernel(u_ref, bm_ref, sum_ref, seed_ref, *, gamma, block_size):
    # u_ref   : (N, Hp, Wp) f32   uniform randoms, border padded with 1.0
    # bm_ref  : (N, H,  W ) bf16  block mask output
    # sum_ref : (1, 1)      f32   sum(block_mask) output
    # seed_ref: (N, Hp, Wp) f32   VMEM scratch (thresholded seed mask)
    _, H, W = bm_ref.shape
    k = block_size

    # Bernoulli seed mask.  The padded border (u == 1.0 >= gamma) thresholds to
    # 0, reproducing max_pool2d's zero padding (mask values are >= 0).
    seed_ref[...] = (u_ref[...] < gamma).astype(jnp.float32)

    # Separable stride-1 max pool: 2*(k-1) shifted maxes on a tiny array.
    # TODO(synk): log2-doubling shifts would cut this to ~2*ceil(log2 k) maxes.
    tmp = seed_ref[:, 0:H, :]
    for dy in range(1, k):
        tmp = jnp.maximum(tmp, seed_ref[:, dy:dy + H, :])
    pooled = tmp[:, :, 0:W]
    for dx in range(1, k):
        pooled = jnp.maximum(pooled, tmp[:, :, dx:dx + W])

    bm = 1.0 - pooled                       # (N, H, W) f32 in {0, 1}
    bm_ref[...] = bm.astype(bm_ref.dtype)
    sum_ref[...] = jnp.broadcast_to(jnp.sum(bm), (1, 1))


def _compute_block_mask_and_sum(u_pad, *, gamma, block_size, H, W):
    """u_pad: (N, Hp, Wp) f32 -> (block_mask (N,H,W) bf16, sum (1,1) f32)."""
    N, Hp, Wp = u_pad.shape
    # Single grid step over all N batches: the mask is C-times smaller than x,
    # so one step removes the per-step overhead of a per-batch grid.
    # TODO(synk): grid over N (with sum accumulation) for very large masks.
    return pl.pallas_call(
        functools.partial(_mask_kernel, gamma=gamma, block_size=block_size),
        out_shape=(jax.ShapeDtypeStruct((N, H, W), jnp.bfloat16),
                   jax.ShapeDtypeStruct((1, 1), jnp.float32)),
        grid=(1,),
        in_specs=[pl.BlockSpec((N, Hp, Wp), lambda i: (0, 0, 0))],
        out_specs=(pl.BlockSpec((N, H, W), lambda i: (0, 0, 0)),
                   pl.BlockSpec((1, 1), lambda i: (0, 0))),
        scratch_shapes=[pltpu.VMEM((N, Hp, Wp), jnp.float32)],
        compiler_params=pltpu.CompilerParams(
            dimension_semantics=("arbitrary",),
            vmem_limit_bytes=_VMEM_LIMIT_BYTES),
    )(u_pad)


# ----------------------------------------------------------------------------
# Kernel 2: out = x * block_mask (broadcast over C) * numel / sum
# ----------------------------------------------------------------------------
def _apply_kernel(sum_ref, x_ref, bm_ref, o_ref, *, numel):
    # sum_ref: SMEM (1, 1) f32 -- global sum(block_mask)
    # x_ref / o_ref: (1, tc, th, W) in x.dtype;  bm_ref: (1, th, W) bf16
    scale = numel / sum_ref[0, 0]
    # Pre-scale the small mask tile once (exact: mask is {0,1}), then a single
    # broadcast multiply in x's dtype (no full-width upcast for bf16 x).
    bm = (bm_ref[...].astype(jnp.float32) * scale).astype(x_ref.dtype)
    o_ref[...] = x_ref[...] * bm[:, None, :, :]


def _choose_tiles(N, C, H, W, itemsize):
    """Pick (tc, th): channel / H tile sizes for the apply kernel."""
    # H tiles: multiples of 8 (sublane) that divide H, or full H  -> every
    # store is an unmasked full tile.  W stays the full lane dim.
    th_cands = sorted({H} | {d for d in range(8, H, 8) if H % d == 0},
                      reverse=True)
    tc_cands = sorted({d for d in range(1, C + 1) if C % d == 0}, reverse=True)

    def tile_bytes(tc_, th_):
        return tc_ * th_ * W * itemsize

    # Prefer keeping C whole (the mask tile is reused across all channels per
    # step), then the largest H tile that fits the per-step budget.
    tc, th = tc_cands[-1], th_cands[-1]
    found = False
    for tc_c in tc_cands:
        for th_c in th_cands:
            if tile_bytes(tc_c, th_c) <= _TILE_TARGET_BYTES:
                tc, th, found = tc_c, th_c, True
                break
        if found:
            break

    # v7x megacore: keep enough grid steps for 2 TCs + pipelining, but never
    # shrink below the floor (tiny tiles are pure per-step overhead).
    def steps(tc_, th_):
        return N * (C // tc_) * (H // th_)

    while steps(tc, th) < _MIN_GRID_STEPS:
        sm_th = [t for t in th_cands
                 if t < th and tile_bytes(tc, t) >= _TILE_FLOOR_BYTES]
        sm_tc = [c for c in tc_cands
                 if c < tc and tile_bytes(c, th) >= _TILE_FLOOR_BYTES]
        if sm_th:
            th = sm_th[0]
        elif sm_tc:
            tc = sm_tc[0]
        else:
            break
    return tc, th


def _apply_dropblock(x, block_mask, msum):
    N, C, H, W = x.shape
    tc, th = _choose_tiles(N, C, H, W, x.dtype.itemsize)
    grid = (N, C // tc, H // th)

    return pl.pallas_call(
        functools.partial(_apply_kernel, numel=float(N * H * W)),
        out_shape=jax.ShapeDtypeStruct((N, C, H, W), x.dtype),
        grid=grid,
        in_specs=[
            pl.BlockSpec(memory_space=pltpu.MemorySpace.SMEM),            # sum
            pl.BlockSpec((1, tc, th, W), lambda n, c, h: (n, c, h, 0)),   # x
            pl.BlockSpec((1, th, W), lambda n, c, h: (n, h, 0)),          # mask
        ],
        out_specs=pl.BlockSpec((1, tc, th, W), lambda n, c, h: (n, c, h, 0)),
        compiler_params=pltpu.CompilerParams(
            dimension_semantics=("parallel", "parallel", "parallel"),
            vmem_limit_bytes=_VMEM_LIMIT_BYTES),
    )(msum, x, block_mask)


# ----------------------------------------------------------------------------
# Public forward
# ----------------------------------------------------------------------------
@functools.partial(jax.jit, static_argnames=("drop_prob", "block_size", "training"))
def dropblock2d_forward(x, key, *, drop_prob, block_size=7, training=True):
    """x: (N, C, H, W).  key: jax PRNG key.  Returns (N, C, H, W)."""
    if (not training) or drop_prob == 0.0:
        return x

    N, C, H, W = x.shape
    gamma = drop_prob / (block_size ** 2)
    p = block_size // 2

    # Uniforms drawn wrapper-side so a pure-JAX reference with the same key
    # matches; the array is C-times smaller than x.  Border padded with 1.0
    # (>= gamma) so the in-kernel threshold reproduces zero padding.
    # TODO(synk): generate the seed mask in-kernel via pltpu.prng_random_bits
    # (and drop this pad) once RNG bit-compat with the reference isn't needed.
    u = jax.random.uniform(key, (N, H, W), dtype=jnp.float32)
    u_pad = jnp.pad(u, ((0, 0), (p, p), (p, p)), constant_values=1.0)

    block_mask, msum = _compute_block_mask_and_sum(
        u_pad, gamma=gamma, block_size=block_size, H=H, W=W)

    # Note: no zero-guard on the sum (matches the PyTorch module).
    return _apply_dropblock(x, block_mask, msum)


# ----------------------------------------------------------------------------
# Pure-JAX reference of the PyTorch forward (same RNG draw as the kernel path)
# ----------------------------------------------------------------------------
def _reference(x, key, *, drop_prob, block_size):
    N, C, H, W = x.shape
    gamma = drop_prob / block_size ** 2
    mask = (jax.random.uniform(key, (N, H, W)) < gamma).astype(jnp.float32)
    p = block_size // 2
    padded = jnp.pad(mask[:, None], ((0, 0), (0, 0), (p, p), (p, p)))
    pooled = jax.lax.reduce_window(
        padded, -jnp.inf, jax.lax.max,
        (1, 1, block_size, block_size), (1, 1, 1, 1), "VALID")
    if block_size % 2 == 0:
        pooled = pooled[:, :, :-1, :-1]
    block_mask = 1.0 - pooled[:, 0]
    out = x * block_mask[:, None, :, :]
    return out * block_mask.size / jnp.sum(block_mask)


if __name__ == "__main__":
    key = jax.random.PRNGKey(0)
    k_x, k_m1, k_m2 = jax.random.split(key, 3)

    N, C, H, W = 2, 4, 16, 16
    x = jax.random.normal(k_x, (N, C, H, W), dtype=jnp.float32)

    # Config 1: module default (odd) block size.
    out1 = jax.block_until_ready(
        dropblock2d_forward(x, k_m1, drop_prob=0.5, block_size=7, training=True))
    ref1 = _reference(x, k_m1, drop_prob=0.5, block_size=7)
    assert out1.shape == (N, C, H, W)
    assert jnp.allclose(out1, ref1, atol=1e-5, rtol=1e-5), "mismatch (block_size=7)"

    # Config 2: even block size (exercises the [:-1,:-1] crop semantics).
    out2 = jax.block_until_ready(
        dropblock2d_forward(x, k_m2, drop_prob=0.3, block_size=4, training=True))
    ref2 = _reference(x, k_m2, drop_prob=0.3, block_size=4)
    assert jnp.allclose(out2, ref2, atol=1e-5, rtol=1e-5), "mismatch (block_size=4)"

    # Eval mode / drop_prob == 0: identity.
    out3 = jax.block_until_ready(
        dropblock2d_forward(x, k_m1, drop_prob=0.5, block_size=7, training=False))
    assert jnp.allclose(out3, x), "eval mode must be identity"

    print("KERNEL_OK")
</pallas_src>

<mosaic_0001>
module attributes {stable_mosaic.version = 11 : i64} {
  func.func @_apply_kernel(%arg0: i32, %arg1: i32, %arg2: i32, %arg3: memref<1x1xf32, #tpu.memory_space<smem>>, %arg4: memref<1x4x16x16xf32, #tpu.memory_space<vmem>>, %arg5: memref<1x16x16xbf16, #tpu.memory_space<vmem>>, %arg6: memref<1x4x16x16xf32, #tpu.memory_space<vmem>>) attributes {dimension_semantics = [#tpu.dimension_semantics<parallel>, #tpu.dimension_semantics<parallel>, #tpu.dimension_semantics<parallel>], iteration_bounds = array<i64: 2, 1, 1>, scalar_prefetch = 0 : i64, scratch_operands = 0 : i64, tpu.core_type = #tpu.core_type<tc>, window_params = [{transform_indices = @transform_0, window_bounds = array<i64: 1, 1>}, {transform_indices = @transform_1, window_bounds = array<i64: 1, 4, 16, 16>}, {transform_indices = @transform_2, window_bounds = array<i64: 1, 16, 16>}, {transform_indices = @transform_3, window_bounds = array<i64: 1, 4, 16, 16>}]} {
    %c0 = arith.constant 0 : index
    %c0_0 = arith.constant 0 : index
    %0 = memref.load %arg3[%c0, %c0_0] : memref<1x1xf32, #tpu.memory_space<smem>>
    %cst = arith.constant 5.120000e+02 : f32
    %1 = arith.divf %cst, %0 : f32
    %c0_1 = arith.constant 0 : index
    %c0_2 = arith.constant 0 : index
    %c0_3 = arith.constant 0 : index
    %2 = vector.load %arg5[%c0_1, %c0_2, %c0_3] : memref<1x16x16xbf16, #tpu.memory_space<vmem>>, vector<1x16x16xbf16>
    %3 = arith.extf %2 : vector<1x16x16xbf16> to vector<1x16x16xf32>
    %4 = vector.broadcast %1 : f32 to vector<1x16x16xf32>
    %5 = arith.mulf %3, %4 : vector<1x16x16xf32>
    %c0_4 = arith.constant 0 : index
    %c0_5 = arith.constant 0 : index
    %c0_6 = arith.constant 0 : index
    %c0_7 = arith.constant 0 : index
    %6 = vector.load %arg4[%c0_4, %c0_5, %c0_6, %c0_7] : memref<1x4x16x16xf32, #tpu.memory_space<vmem>>, vector<1x4x16x16xf32>
    %7 = vector.shape_cast %5 : vector<1x16x16xf32> to vector<1x1x16x16xf32>
    %8 = vector.broadcast %7 : vector<1x1x16x16xf32> to vector<1x4x16x16xf32>
    %9 = arith.mulf %6, %8 : vector<1x4x16x16xf32>
    %c0_8 = arith.constant 0 : index
    %c0_9 = arith.constant 0 : index
    %c0_10 = arith.constant 0 : index
    %c0_11 = arith.constant 0 : index
    %10 = vector.load %arg6[%c0_8, %c0_9, %c0_10, %c0_11] : memref<1x4x16x16xf32, #tpu.memory_space<vmem>>, vector<1x4x16x16xf32>
    tpu.vector_store %arg6[%c0_8, %c0_9, %c0_10, %c0_11], %9 {strides = array<i32>} : memref<1x4x16x16xf32, #tpu.memory_space<vmem>>, vector<1x4x16x16xf32>,
    return
  }
  func.func @transform_0(%arg0: i32, %arg1: i32, %arg2: i32) -> (i32, i32) {
    %c0_i32 = arith.constant 0 : i32
    %c0_i32_0 = arith.constant 0 : i32
    %c0_i32_1 = arith.constant 0 : i32
    return %c0_i32, %c0_i32_0 : i32, i32
  }
  func.func @transform_1(%arg0: i32, %arg1: i32, %arg2: i32) -> (i32, i32, i32, i32) {
    %c0_i32 = arith.constant 0 : i32
    %c0_i32_0 = arith.constant 0 : i32
    return %arg0, %arg1, %arg2, %c0_i32 : i32, i32, i32, i32
  }
  func.func @transform_2(%arg0: i32, %arg1: i32, %arg2: i32) -> (i32, i32, i32) {
    %c0_i32 = arith.constant 0 : i32
    %c0_i32_0 = arith.constant 0 : i32
    return %arg0, %arg2, %c0_i32 : i32, i32, i32
  }
  func.func @transform_3(%arg0: i32, %arg1: i32, %arg2: i32) -> (i32, i32, i32, i32) {
    %c0_i32 = arith.constant 0 : i32
    %c0_i32_0 = arith.constant 0 : i32
    return %arg0, %arg1, %arg2, %c0_i32 : i32, i32, i32, i32
  }
}

module attributes {stable_mosaic.version = 11 : i64} {
  func.func @_mask_kernel(%arg0: i32, %arg1: memref<2x22x22xf32, #tpu.memory_space<vmem>>, %arg2: memref<2x16x16xbf16, #tpu.memory_space<vmem>>, %arg3: memref<1x1xf32, #tpu.memory_space<vmem>>, %arg4: memref<2x22x22xf32, #tpu.memory_space<vmem>>) attributes {dimension_semantics = [#tpu.dimension_semantics<arbitrary>], iteration_bounds = array<i64: 1>, scalar_prefetch = 0 : i64, scratch_operands = 1 : i64, tpu.core_type = #tpu.core_type<tc>, window_params = [{pipeline_mode = #tpu.pipeline_mode<synchronous>, transform_indices = @transform_0, window_bounds = array<i64: 2, 22, 22>}, {pipeline_mode = #tpu.pipeline_mode<synchronous>, transform_indices = @transform_1, window_bounds = array<i64: 2, 16, 16>}, {pipeline_mode = #tpu.pipeline_mode<synchronous>, transform_indices = @transform_2, window_bounds = array<i64: 1, 1>}]} {
    %c0 = arith.constant 0 : index
    %c0_0 = arith.constant 0 : index
    %c0_1 = arith.constant 0 : index
    %0 = vector.load %arg1[%c0, %c0_0, %c0_1] : memref<2x22x22xf32, #tpu.memory_space<vmem>>, vector<2x22x22xf32>
    %cst = arith.constant 0.0102040814 : f32
    %1 = vector.broadcast %cst : f32 to vector<2x22x22xf32>
    %2 = arith.cmpf olt, %0, %1 : vector<2x22x22xf32>
    %3 = arith.extui %2 : vector<2x22x22xi1> to vector<2x22x22xi32>
    %4 = arith.sitofp %3 : vector<2x22x22xi32> to vector<2x22x22xf32>
    %c0_2 = arith.constant 0 : index
    %c0_3 = arith.constant 0 : index
    %c0_4 = arith.constant 0 : index
    %5 = vector.load %arg4[%c0_2, %c0_3, %c0_4] : memref<2x22x22xf32, #tpu.memory_space<vmem>>, vector<2x22x22xf32>
    tpu.vector_store %arg4[%c0_2, %c0_3, %c0_4], %4 {strides = array<i32>} : memref<2x22x22xf32, #tpu.memory_space<vmem>>, vector<2x22x22xf32>,
    %c0_5 = arith.constant 0 : index
    %c0_6 = arith.constant 0 : index
    %c0_7 = arith.constant 0 : index
    %6 = vector.load %arg4[%c0_5, %c0_6, %c0_7] : memref<2x22x22xf32, #tpu.memory_space<vmem>>, vector<2x16x22xf32>
    %c0_8 = arith.constant 0 : index
    %c1 = arith.constant 1 : index
    %c0_9 = arith.constant 0 : index
    %7 = vector.load %arg4[%c0_8, %c1, %c0_9] : memref<2x22x22xf32, #tpu.memory_space<vmem>>, vector<2x16x22xf32>
    %8 = arith.maximumf %6, %7 : vector<2x16x22xf32>
    %c0_10 = arith.constant 0 : index
    %c2 = arith.constant 2 : index
    %c0_11 = arith.constant 0 : index
    %9 = vector.load %arg4[%c0_10, %c2, %c0_11] : memref<2x22x22xf32, #tpu.memory_space<vmem>>, vector<2x16x22xf32>
    %10 = arith.maximumf %8, %9 : vector<2x16x22xf32>
    %c0_12 = arith.constant 0 : index
    %c3 = arith.constant 3 : index
    %c0_13 = arith.constant 0 : index
    %11 = vector.load %arg4[%c0_12, %c3, %c0_13] : memref<2x22x22xf32, #tpu.memory_space<vmem>>, vector<2x16x22xf32>
    %12 = arith.maximumf %10, %11 : vector<2x16x22xf32>
    %c0_14 = arith.constant 0 : index
    %c4 = arith.constant 4 : index
    %c0_15 = arith.constant 0 : index
    %13 = vector.load %arg4[%c0_14, %c4, %c0_15] : memref<2x22x22xf32, #tpu.memory_space<vmem>>, vector<2x16x22xf32>
    %14 = arith.maximumf %12, %13 : vector<2x16x22xf32>
    %c0_16 = arith.constant 0 : index
    %c5 = arith.constant 5 : index
    %c0_17 = arith.constant 0 : index
    %15 = vector.load %arg4[%c0_16, %c5, %c0_17] : memref<2x22x22xf32, #tpu.memory_space<vmem>>, vector<2x16x22xf32>
    %16 = arith.maximumf %14, %15 : vector<2x16x22xf32>
    %c0_18 = arith.constant 0 : index
    %c6 = arith.constant 6 : index
    %c0_19 = arith.constant 0 : index
    %17 = vector.load %arg4[%c0_18, %c6, %c0_19] : memref<2x22x22xf32, #tpu.memory_space<vmem>>, vector<2x16x22xf32>
    %18 = arith.maximumf %16, %17 : vector<2x16x22xf32>
    %19 = vector.extract_strided_slice %18 {offsets = [0, 0, 0], sizes = [2, 16, 16], strides = [1, 1, 1]} : vector<2x16x22xf32> to vector<2x16x16xf32>
    %20 = vector.extract_strided_slice %18 {offsets = [0, 0, 1], sizes = [2, 16, 16], strides = [1, 1, 1]} : vector<2x16x22xf32> to vector<2x16x16xf32>
    %21 = arith.maximumf %19, %20 : vector<2x16x16xf32>
    %22 = vector.extract_strided_slice %18 {offsets = [0, 0, 2], sizes = [2, 16, 16], strides = [1, 1, 1]} : vector<2x16x22xf32> to vector<2x16x16xf32>
    %23 = arith.maximumf %21, %22 : vector<2x16x16xf32>
    %24 = vector.extract_strided_slice %18 {offsets = [0, 0, 3], sizes = [2, 16, 16], strides = [1, 1, 1]} : vector<2x16x22xf32> to vector<2x16x16xf32>
    %25 = arith.maximumf %23, %24 : vector<2x16x16xf32>
    %26 = vector.extract_strided_slice %18 {offsets = [0, 0, 4], sizes = [2, 16, 16], strides = [1, 1, 1]} : vector<2x16x22xf32> to vector<2x16x16xf32>
    %27 = arith.maximumf %25, %26 : vector<2x16x16xf32>
    %28 = vector.extract_strided_slice %18 {offsets = [0, 0, 5], sizes = [2, 16, 16], strides = [1, 1, 1]} : vector<2x16x22xf32> to vector<2x16x16xf32>
    %29 = arith.maximumf %27, %28 : vector<2x16x16xf32>
    %30 = vector.extract_strided_slice %18 {offsets = [0, 0, 6], sizes = [2, 16, 16], strides = [1, 1, 1]} : vector<2x16x22xf32> to vector<2x16x16xf32>
    %31 = arith.maximumf %29, %30 : vector<2x16x16xf32>
    %cst_20 = arith.constant 1.000000e+00 : f32
    %32 = vector.broadcast %cst_20 : f32 to vector<2x16x16xf32>
    %33 = arith.subf %32, %31 : vector<2x16x16xf32>
    %34 = arith.truncf %33 : vector<2x16x16xf32> to vector<2x16x16xbf16>
    %c0_21 = arith.constant 0 : index
    %c0_22 = arith.constant 0 : index
    %c0_23 = arith.constant 0 : index
    %35 = vector.load %arg2[%c0_21, %c0_22, %c0_23] : memref<2x16x16xbf16, #tpu.memory_space<vmem>>, vector<2x16x16xbf16>
    tpu.vector_store %arg2[%c0_21, %c0_22, %c0_23], %34 {strides = array<i32>} : memref<2x16x16xbf16, #tpu.memory_space<vmem>>, vector<2x16x16xbf16>,
    %36 = vector.shape_cast %33 : vector<2x16x16xf32> to vector<1x2x16x16xf32>
    %cst_24 = arith.constant dense<0.000000e+00> : vector<1xf32>
    %37 = vector.multi_reduction <add>, %36, %cst_24 [1, 2, 3] : vector<1x2x16x16xf32> to vector<1xf32>
    %38 = vector.shape_cast %37 : vector<1xf32> to vector<1x1x1x1xf32>
    %39 = vector.extract %38[0, 0, 0, 0] : f32 from vector<1x1x1x1xf32>
    %40 = vector.broadcast %39 : f32 to vector<1x1xf32>
    %c0_25 = arith.constant 0 : index
    %c0_26 = arith.constant 0 : index
    %41 = vector.load %arg3[%c0_25, %c0_26] : memref<1x1xf32, #tpu.memory_space<vmem>>, vector<1x1xf32>
    tpu.vector_store %arg3[%c0_25, %c0_26], %40 {strides = array<i32>} : memref<1x1xf32, #tpu.memory_space<vmem>>, vector<1x1xf32>,
    return
  }
  func.func @transform_0(%arg0: i32) -> (i32, i32, i32) {
    %c0_i32 = arith.constant 0 : i32
    %c0_i32_0 = arith.constant 0 : i32
    %c0_i32_1 = arith.constant 0 : i32
    %c0_i32_2 = arith.constant 0 : i32
    return %c0_i32, %c0_i32_0, %c0_i32_1 : i32, i32, i32
  }
  func.func @transform_1(%arg0: i32) -> (i32, i32, i32) {
    %c0_i32 = arith.constant 0 : i32
    %c0_i32_0 = arith.constant 0 : i32
    %c0_i32_1 = arith.constant 0 : i32
    %c0_i32_2 = arith.constant 0 : i32
    return %c0_i32, %c0_i32_0, %c0_i32_1 : i32, i32, i32
  }
  func.func @transform_2(%arg0: i32) -> (i32, i32) {
    %c0_i32 = arith.constant 0 : i32
    %c0_i32_0 = arith.constant 0 : i32
    %c0_i32_1 = arith.constant 0 : i32
    return %c0_i32, %c0_i32_0 : i32, i32
  }
}

</mosaic_0001>

<bundles_post_ra>
// kernel: dropblock2d_forward.3
= control target key start
LH: loop header
LB: loop body
LE: loop exit
PB: predicated region body
PF: predicated region fallthrough
CT: control target
= control target key end

     0   :  { %s749_s0 = inlined_call_operand.<no memory space> [shape: f32[1,1], index: 0, kind: input, shape index: {}]   ;;  %s750_s1 = inlined_call_operand.vmem [shape: f32[2,4,16,16], index: 1, kind: input, shape index: {}]   ;;  %s751_s2 = inlined_call_operand.vmem [shape: bf16[2,16,16], index: 2, kind: input, shape index: {}]   ;;  %s752_s3 = inlined_call_operand.hbm [shape: f32[2,4,16,16], index: 3, kind: output, shape index: {}]  }
   0x1   :  { %8 = sst [smem:[#allocation2]] %s749_s0 }
   0x2   :  { %9 = vsyncpa [#allocation4], 0 }
   0x3   :  { %11 = vsyncpa [#allocation4 + $0x1], 0  ;;  %s619_s14 = smov 0   ;;  %s621_s15 = smov 0  }
   0x4   :  { %s623_s16 = smov 0   ;;  %s625_s17 = smov 0  }
   0x5   :  { %s627_s18 = smov 0   ;;  %s629_s19 = smov 0  }
   0x6 LB: > { %s430_s0 = sadd.s32 4294967295, %s591_s19   ;;  %s431_s20 = sadd.s32 4294967294, %s591_s19   ;;  %s591_s19 = sphi %s629_s19, %s17_s19   ;;  %s587_s18 = sphi %s627_s18, %s759_s18   ;;  %s583_s17 = sphi %s625_s17, %s758_s17   ;;  %s579_s16 = sphi %s623_s16, %s757_s16   ;;  %s575_s15 = sphi %s621_s15, %s756_s15   ;;  %s571_s14 = sphi %s619_s14, %s755_s14  }
   0x7   : > { %s36_s21 = sadd.s32 1, %s587_s18  ;;  %s126_s22 = sadd.s32 1, %s579_s16 }
   0x8   : > { %p38_p0 = scmp.ge.s32.totalorder %s36_s21, 2  ;;  %p136_p1 = scmp.ne.s32.totalorder %s579_s16, %s575_s15 }
   0x9   : > { %p137_p2 = scmp.eq.s32.totalorder %s430_s0, 1  ;;  %p142_p3 = scmp.ne.s32.totalorder %s575_s15, %s571_s14 }
   0xa   : > { %s761_s21 = smov (%p38_p0, %s36_s21), 0  ;;  %p143_p5 = scmp.eq.s32.totalorder %s431_s20, 1 }
   0xb   : > { %p659_p4 = por %p137_p2, %p136_p1  ;;  %s119_s24 = ssub.s32 %s587_s18, %s761_s21 }
   0xc   : > { %p434_p6 = scmp.ge.s32.totalorder %s591_s19, 1  ;;  %p124_p7 = scmp.eq.s32.totalorder %s119_s24, 0 }
   0xd   : > { %p666_p8 = por %p143_p5, %p142_p3  ;;  %p196_p9 = scmp.lt.s32.totalorder %s591_s19, 3 }
   0xe   : > { %s672_s26 = scalar_select %p124_p7, %s579_s16, %s126_s22  }
   0xf   : > { %p197_p10 = pnand %p434_p6, %p196_p9 }
  0x10   : > { %s266_s27 = sld [smem:[#allocation2]] (!%p197_p10)  ;;  %p240_p11 = scmp.lt.s32.totalorder (!%p197_p10), %s583_s17, 1  ;;  %vm294_vm0 = vcmask (!%p197_p10), 130048  }
  0x11   : > { %200 = sbr.rel (%p197_p10) target bundleno = 109 (0x6d), region = 32  ;;  %s235_s30 = sand.u32 (!%p197_p10), 1, %s575_s15  }
  0x12   : > { %s435_s8 = sshll.u32 (!%p197_p10), %s235_s30, 6  ;;  %s447_s0 = sshll.u32 (!%p197_p10), %s583_s17, 10 }
  0x13   : > { %s237_s20 = scalar_lea.vmem (!%p197_p10), [#allocation3], %s435_s8  ;;  %s593_s4 = smov (!%p197_p10), [#allocation3]  }
  0x14   : > { %s322_s22 = sshll.u32 (!%p197_p10), %s237_s20, 4  ;;  %s517_s5 = sshll.u32 (!%p197_p10), %s593_s4, 4  ;;  %s691_s22 = int_to_ptr.vmem [resolvable:$true] %s322_s22  ;;  %s518_s5 = int_to_ptr.vmem [resolvable:$false] %s517_s5 }
  0x15   : > { %p520_p1 = scmp.lt.s32.totalorder (!%p197_p10), %s691_s22, %s518_s5 }
  0x16   : > { %v267_v0 = vstv (!%p197_p10), %s266_s27 }
  0x17   : > { %511 = vrcp.f32 (!%p197_p10), %v267_v0 }
  0x18   : > { %s241_s28 = scalar_select %p240_p11, %s583_s17, 1 }
  0x19   : > { %s703_s17 = scalar_lea.sflag [#allocation4], %s235_s30 }
  0x1a   : > { %s446_s29 = sshll.u32 %s241_s28, 3  ;;  %s445_s7 = sshll.u32 %s241_s28, 6 }
  0x1b   : > { %s262_s6 = scalar_lea.vmem %s751_s2, %s446_s29  ;;  %s251_s11 = scalar_lea.vmem %s750_s1, %s445_s7 }
  0x1c   : > { %v449_v2 = vld [vmem:[%s262_s6] sm:$0xff]   ;;  %v279_v6 = vld [vmem:[%s251_s11 + $0x8] sm:$0xff]  ;;  %v280_v8 = vld [vmem:[%s251_s11 + $0x10] sm:$0xff]  ;;  %s689_s28 = scalar_lea.hbm %s752_s3, %s447_s0  ;;  %s513_s29 = scalar_lea.vmem %s691_s22, 1024 }
  0x1d   : > { %v450_v3 = vunpack.c.l.bf16 %v449_v2  ;;  %v451_v4 = vunpack.c.h.bf16 %v449_v2  ;;  %v278_v5 = vld [vmem:[%s251_s11] sm:$0xff]  ;;  %v281_v9 = vld [vmem:[%s251_s11 + $0x18] sm:$0xff]  ;;  %v283_v13 = vld [vmem:[%s251_s11 + $0x28] sm:$0xff]  ;;  %p514_p12 = scmp.ne.s32.totalorder %s691_s22, %s513_s29  ;;  %s519_s6 = scalar_lea.vmem %s518_s5, 2048 }
  0x1e   : > { %v282_v10 = vld [vmem:[%s251_s11 + $0x20] sm:$0xff]  ;;  %v284_v14 = vld [vmem:[%s251_s11 + $0x30] sm:$0xff]  ;;  %v285_v15 = vld [vmem:[%s251_s11 + $0x38] sm:$0xff]  ;;  %p521_p2 = scmp.lt.s32.totalorder %s519_s6, %s513_s29 }
  0x1f   : > { %p515_p13 = pnand %p514_p12, %p659_p4 }
  0x20   : > { %p522_p3 = por %p521_p2, %p520_p1 }
  0x21   : > { %v512_v1 = vpop.eup %511  ;;  %p516_p0 = pneg %p515_p13 }
  0x22   : > { %452 = vpush %v512_v1 }
  0x23   : > { %p523_p5 = pnand %p522_p3, %p516_p0 }
  0x53   : > { %s453_s12 = spop %452 }
  0x54   : > { %s270_s13 = smul.f32 512.0, %s453_s12 }
  0x56   : > { %v275_v7 = vstv %s270_s13 }
  0x57   : > { %v276_v11 = vmul.f32 %v450_v3, %v275_v7  ;;  %v277_v12 = vmul.f32 %v451_v4, %v275_v7 }
  0x59   : > { %v286_v16 = vmul.f32 %v278_v5, %v276_v11  ;;  %v287_v17 = vmul.f32 %v279_v6, %v277_v12  ;;  %v288_v18 = vmul.f32 %v280_v8, %v276_v11  ;;  %v289_v19 = vmul.f32 %v281_v9, %v277_v12 }
  0x5a   : > { %v290_v20 = vmul.f32 %v282_v10, %v276_v11  ;;  %v291_v21 = vmul.f32 %v283_v13, %v277_v12  ;;  %v292_v22 = vmul.f32 %v284_v14, %v276_v11  ;;  %v293_v23 = vmul.f32 %v285_v15, %v277_v12 }
  0x5b   : > { %295 = vst.msk [vmem:[%s237_s20] sm:$0xff] %vm294_vm0, %v286_v16  ;;  %296 = vst.msk [vmem:[%s237_s20 + $0x8] sm:$0xff] %vm294_vm0, %v287_v17 }
  0x5c   : > { %297 = vst.msk [vmem:[%s237_s20 + $0x10] sm:$0xff] %vm294_vm0, %v288_v18  ;;  %298 = vst.msk [vmem:[%s237_s20 + $0x18] sm:$0xff] %vm294_vm0, %v289_v19 }
  0x5d   : > { %299 = vst.msk [vmem:[%s237_s20 + $0x20] sm:$0xff] %vm294_vm0, %v290_v20  ;;  %300 = vst.msk [vmem:[%s237_s20 + $0x28] sm:$0xff] %vm294_vm0, %v291_v21 }
  0x5e   : > { %301 = vst.msk [vmem:[%s237_s20 + $0x30] sm:$0xff] %vm294_vm0, %v292_v22  ;;  %302 = vst.msk [vmem:[%s237_s20 + $0x38] sm:$0xff] %vm294_vm0, %v293_v23 }
  0x5f   : > { %526 = shalt.err (!%p523_p5)
}
  0x60   : > { %s527_s30 = scalar_lea.hbm %s689_s28, 1024  ;;  %s531_s9 = scalar_lea.hbm %s752_s3, 2048 }
  0x61   : > { %p528_p6 = scmp.ne.s32.totalorder %s689_s28, %s527_s30  ;;  %p532_p10 = scmp.lt.u32.totalorder %s689_s28, %s752_s3 }
  0x62   : > { %p533_p11 = scmp.lt.u32.totalorder %s531_s9, %s527_s30  ;;  %p535_p13 = scmp.lt.u32.totalorder %s527_s30, %s689_s28 }
  0x63   : > { %p529_p7 = pnand %p528_p6, %p659_p4 }
  0x64   : > { %p534_p12 = por %p533_p11, %p532_p10 }
  0x65   : > { %p530_p9 = pneg %p529_p7 }
  0x66   : > { %p536_p0 = por %p535_p13, %p534_p12 }
  0x68   : > { %p537_p1 = pnand %p536_p0, %p530_p9 }
  0x6a   : > { %540 = shalt.err (!%p537_p1)
}
  0x6b   : > { %s594_s12 = smov 128   ;;  %s595_s13 = smov 8  }
  0x6c   : > { %454 = dma.vmem_to_hbm [thread:$0]  (%p659_p4), %s691_s22, 1024, %s689_s28, %s703_s17, %s594_s12, %s594_s12, %s595_s13  }
  0x6d PF: > { %p460_p2 = scmp.ge.s32.totalorder %s591_s19, 2  ;;  %s337_s0 = sand.u32 1, %s571_s14  }
  0x6e   : > { %s338_s20 = scalar_lea.sflag [#allocation4], %s337_s0 }
  0x6f   : > { %p457_p3 = pnand %p460_p2, %p666_p8 }
  0x71   : > { %566 = dma.done.wait (!%p457_p3), %s338_s20, 1024  }
  0x72   : > { %568 = vsyncadd (!%p457_p3), %s338_s20, 4294966272  ;;  %s17_s19 = sadd.s32 1, %s591_s19   ;;  %s755_s14 = smov %s575_s15 }
  0x73   : > { %p14_p5 = scmp.ge.s32.totalorder %s17_s19, 4   ;;  %s756_s15 = smov %s579_s16 }
  0x74   : > { %s757_s16 = smov %s672_s26  ;;  %s758_s17 = smov %s587_s18 }
  0x75   : > { %s759_s18 = smov %s761_s21  ;;  %16 = sbr.rel (!%p14_p5) target bundleno = 6 (0x6), region = 70 }
  0x7c   :  { %343 = vsyncpa [#allocation4], 1 }
  0x7d   :  { %345 = vsyncpa [#allocation4 + $0x1], 1 }

// kernel: dropblock2d_forward.2
= control target key start
LH: loop header
LB: loop body
LE: loop exit
PB: predicated region body
PF: predicated region fallthrough
CT: control target
= control target key end

     0   :  { %vm35_vm0 = vcmask 179200   ;;  %v306_v4 = vmov 0.0   ;;  %vm38_vm5 = vcmask 177152   ;;  %s392_s0 = inlined_call_operand.vmem [shape: f32[2,22,22], index: 0, kind: input, shape index: {}]   ;;  %s393_s1 = inlined_call_operand.vmem [shape: bf16[2,16,16], index: 1, kind: output, shape index: {0}]   ;;  %s394_s2 = inlined_call_operand.hbm [shape: f32[1,1], index: 2, kind: output, shape index: {1}]  }
   0x1   :  { %v14_v0 = vld [vmem:[%s392_s0 + $0x18] sm:$0xff]  ;;  %v15_v1 = vld [vmem:[%s392_s0 + $0x20] sm:$0xff]  ;;  %v12_v3 = vld [vmem:[%s392_s0 + $0x8] sm:$0xff] }
   0x2   :  { %v11_v2 = vld [vmem:[%s392_s0] sm:$0xff]  ;;  %vm20_vm1 = vcmp.lt.f32.partialorder %v14_v0, 0.010204081  ;;  %vm21_vm2 = vcmp.lt.f32.partialorder %v15_v1, 0.010204081 }
   0x3   :  { %v261_v5 = vsel %vm20_vm1, 1.0, %v306_v4  ;;  %v262_v6 = vsel %vm21_vm2, 1.0, %v306_v4  ;;  %vm17_vm3 = vcmp.lt.f32.partialorder %v11_v2, 0.010204081  ;;  %vm18_vm4 = vcmp.lt.f32.partialorder %v12_v3, 0.010204081 }
   0x4   :  { %40 = vst.msk [vmem:[#allocation2 + $0x18] sm:$0xff] %vm35_vm0, %v261_v5  ;;  %41 = vst.msk [vmem:[#allocation2 + $0x20] sm:$0xff] %vm35_vm0, %v262_v6  ;;  %v258_v7 = vsel %vm17_vm3, 1.0, %v306_v4  ;;  %v259_v8 = vsel %vm18_vm4, 1.0, %v306_v4  ;;  %v13_v9 = vld [vmem:[%s392_s0 + $0x10] sm:$0x3f] }
   0x5   :  { %36 = vst.msk [vmem:[#allocation2] sm:$0xff] %vm35_vm0, %v258_v7  ;;  %37 = vst.msk [vmem:[#allocation2 + $0x8] sm:$0xff] %vm35_vm0, %v259_v8  ;;  %vm19_vm6 = vcmp.lt.f32.partialorder %v13_v9, 0.010204081  ;;  %v16_v10 = vld [vmem:[%s392_s0 + $0x28] sm:$0x3f] }
   0x6   :  { %v260_v11 = vsel %vm19_vm6, 1.0, %v306_v4  ;;  %vm22_vm7 = vcmp.lt.f32.partialorder %v16_v10, 0.010204081 }
   0x7   :  { %8 = vsyncpa [#allocation4], 0  ;;  %39 = vst.msk [vmem:[#allocation2 + $0x10] sm:$0x3f] %vm38_vm5, %v260_v11  ;;  %v263_v12 = vsel %vm22_vm7, 1.0, %v306_v4  ;;  %s307_s0 = smov 127  }
   0x8   :  { %42 = vst.msk [vmem:[#allocation2 + $0x28] sm:$0x3f] %vm38_vm5, %v263_v12  ;;  %s308_s21 = smov 126   ;;  %s309_s22 = smov 125   ;;  %vm215_vm8 = vcmask 125952   ;;  %vm220_vm9 = vcmask 130048  }
   0x9   :  { %s310_s23 = smov 124   ;;  %s311_s24 = smov 123   ;;  %vm238_vm10 = vcmask 0  }
   0xa   :  { %s312_s25 = smov 122   ;;  %s313_s6 = smov [#allocation3]  }
   0xb   :  { %v45_v13 = vld [vmem:[#allocation2 + $0x18] sm:$0xff]  ;;  %v46_v36 = vld [vmem:[#allocation2 + $0x20] sm:$0xff]  ;;  %s248_s7 = sshll.u32 %s313_s6, 4  ;;  %s249_s7 = int_to_ptr.vmem [resolvable:$true] %s248_s7 }
   0xc   :  { %v49_v14 = vld [vmem:[#allocation2 + $0x19] sm:$0xff]  ;;  %v47_v19 = vld [vmem:[#allocation2 + $0x1] sm:$0xff]  ;;  %s286_s9 = scalar_lea.vmem %s249_s7, 32  ;;  %p287_p1 = scmp.lt.s32.totalorder %s249_s7, %s249_s7 }
   0xd   :  { %v57_v15 = vld [vmem:[#allocation2 + $0x1a] sm:$0xff]  ;;  %v53_v16 = vmax.f32 %v45_v13, %v49_v14  ;;  %v55_v22 = vld [vmem:[#allocation2 + $0x2] sm:$0xff] }
   0xe   :  { %v65_v17 = vld [vmem:[#allocation2 + $0x1b] sm:$0xff]  ;;  %v63_v24 = vld [vmem:[#allocation2 + $0x3] sm:$0xff]  ;;  %v64_v33 = vld [vmem:[#allocation2 + $0xb] sm:$0xff] }
   0xf   :  { %v43_v18 = vld [vmem:[#allocation2] sm:$0xff]  ;;  %v61_v20 = vmax.f32 %v53_v16, %v57_v15  ;;  %v44_v25 = vld [vmem:[#allocation2 + $0x8] sm:$0xff] }
  0x10   :  { %v51_v21 = vmax.f32 %v43_v18, %v47_v19  ;;  %v73_v23 = vld [vmem:[#allocation2 + $0x1c] sm:$0xff]  ;;  %v48_v28 = vld [vmem:[#allocation2 + $0x9] sm:$0xff] }
  0x11   :  { %v69_v26 = vmax.f32 %v61_v20, %v65_v17  ;;  %v56_v29 = vld [vmem:[#allocation2 + $0xa] sm:$0xff]  ;;  %v81_v30 = vld [vmem:[#allocation2 + $0x1d] sm:$0xff]  ;;  %v52_v32 = vmax.f32 %v44_v25, %v48_v28 }
  0x12   :  { %v59_v27 = vmax.f32 %v51_v21, %v55_v22  ;;  %v71_v31 = vld [vmem:[#allocation2 + $0x4] sm:$0xff]  ;;  %v72_v45 = vld [vmem:[#allocation2 + $0xc] sm:$0xff] }
  0x13   :  { %v77_v34 = vmax.f32 %v69_v26, %v73_v23  ;;  %v50_v37 = vld [vmem:[#allocation2 + $0x21] sm:$0xff]  ;;  %v60_v41 = vmax.f32 %v52_v32, %v56_v29  ;;  %v80_v52 = vld [vmem:[#allocation2 + $0xd] sm:$0xff] }
  0x14   :  { %v67_v35 = vmax.f32 %v59_v27, %v63_v24  ;;  %v58_v38 = vld [vmem:[#allocation2 + $0x22] sm:$0xff]  ;;  %v54_v42 = vmax.f32 %v46_v36, %v50_v37  ;;  %v88_v57 = vld [vmem:[#allocation2 + $0xe] sm:$0xff] }
  0x15   :  { %v89_v39 = vld [vmem:[#allocation2 + $0x1e] sm:$0xff]  ;;  %v85_v43 = vmax.f32 %v77_v34, %v81_v30  ;;  %v87_v47 = vld [vmem:[#allocation2 + $0x6] sm:$0xff]  ;;  %v68_v48 = vmax.f32 %v60_v41, %v64_v33 }
  0x16   :  { %v79_v40 = vld [vmem:[#allocation2 + $0x5] sm:$0xff]  ;;  %v75_v44 = vmax.f32 %v67_v35, %v71_v31  ;;  %v62_v49 = vmax.f32 %v54_v42, %v58_v38 }
  0x17   :  { %v66_v46 = vld [vmem:[#allocation2 + $0x23] sm:$0xff]  ;;  %v351_v50 = vmax.f32 %v85_v43, %v89_v39  ;;  %v76_v54 = vmax.f32 %v68_v48, %v72_v45 }
  0x18   :  { %v83_v51 = vmax.f32 %v75_v44, %v79_v40  ;;  %v74_v53 = vld [vmem:[#allocation2 + $0x24] sm:$0xff]  ;;  %v70_v55 = vmax.f32 %v62_v49, %v66_v46 }
  0x19   :  { %103 = vrot.lane.b32.xlu1 %v351_v50, %s307_s0  ;;  %v82_v58 = vld [vmem:[#allocation2 + $0x25] sm:$0xff]  ;;  %v84_v59 = vmax.f32 %v76_v54, %v80_v52 }
  0x1a   :  { %v91_v56 = vmax.f32 %v83_v51, %v87_v47  ;;  %v78_v60 = vmax.f32 %v70_v55, %v74_v53  ;;  %v90_v61 = vld [vmem:[#allocation2 + $0x26] sm:$0xff] }
  0x1b   :  { %v92_v62 = vmax.f32 %v84_v59, %v88_v57 }
  0x1c   :  { %99 = vrot.lane.b32.xlu0 %v91_v56, %s307_s0  ;;  %v86_v63 = vmax.f32 %v78_v60, %v82_v58 }
  0x1d   :  { %115 = vrot.lane.b32.xlu1 %v91_v56, %s308_s21 }
  0x1e   :  { %v94_v0 = vmax.f32 %v86_v63, %v90_v61 }
  0x20   :  { %101 = vrot.lane.b32.xlu0 %v92_v62, %s307_s0 }
  0x21   :  { %105 = vrot.lane.b32.xlu1 %v94_v0, %s307_s0 }
  0x24   :  { %117 = vrot.lane.b32.xlu0 %v92_v62, %s308_s21 }
  0x25   :  { %131 = vrot.lane.b32.xlu1 %v91_v56, %s309_s22 }
  0x28   :  { %119 = vrot.lane.b32.xlu0 %v351_v50, %s308_s21 }
  0x29   :  { %121 = vrot.lane.b32.xlu1 %v94_v0, %s308_s21 }
  0x2c   :  { %133 = vrot.lane.b32.xlu0 %v92_v62, %s309_s22 }
  0x2d   :  { %147 = vrot.lane.b32.xlu1 %v91_v56, %s310_s23 }
  0x30   :  { %135 = vrot.lane.b32.xlu0 %v351_v50, %s309_s22 }
  0x31   :  { %137 = vrot.lane.b32.xlu1 %v94_v0, %s309_s22 }
  0x34   :  { %149 = vrot.lane.b32.xlu0 %v92_v62, %s310_s23 }
  0x35   :  { %163 = vrot.lane.b32.xlu1 %v91_v56, %s311_s24 }
  0x38   :  { %151 = vrot.lane.b32.xlu0 %v351_v50, %s310_s23 }
  0x39   :  { %153 = vrot.lane.b32.xlu1 %v94_v0, %s310_s23 }
  0x3c   :  { %165 = vrot.lane.b32.xlu0 %v92_v62, %s311_s24 }
  0x3d   :  { %179 = vrot.lane.b32.xlu1 %v91_v56, %s312_s25 }
  0x40   :  { %167 = vrot.lane.b32.xlu0 %v351_v50, %s311_s24 }
  0x41   :  { %169 = vrot.lane.b32.xlu1 %v94_v0, %s311_s24 }
  0x44   :  { %181 = vrot.lane.b32.xlu0 %v92_v62, %s312_s25 }
  0x45   :  { %185 = vrot.lane.b32.xlu1 %v94_v0, %s312_s25 }
  0x48   :  { %183 = vrot.lane.b32.xlu0 %v351_v50, %s312_s25 }
  0x8b   :  { %v104_v1 = vpop.permute.xlu1 %103 }
  0x8c   :  { %v113_v28 = vmax.f32 %v351_v50, %v104_v1 }
  0x8e   :  { %v100_v2 = vpop.permute.xlu0 %99 }
  0x8f   :  { %v116_v3 = vpop.permute.xlu1 %115  ;;  %v111_v15 = vmax.f32 %v91_v56, %v100_v2 }
  0x91   :  { %v127_v17 = vmax.f32 %v111_v15, %v116_v3 }
  0x92   :  { %v102_v4 = vpop.permute.xlu0 %101 }
  0x93   :  { %v106_v5 = vpop.permute.xlu1 %105  ;;  %v112_v21 = vmax.f32 %v92_v62, %v102_v4 }
  0x94   :  { %v114_v24 = vmax.f32 %v94_v0, %v106_v5 }
  0x96   :  { %v118_v6 = vpop.permute.xlu0 %117 }
  0x97   :  { %v132_v7 = vpop.permute.xlu1 %131  ;;  %v128_v25 = vmax.f32 %v112_v21, %v118_v6 }
  0x98   :  { %v143_v19 = vmax.f32 %v127_v17, %v132_v7 }
  0x9a   :  { %v120_v8 = vpop.permute.xlu0 %119 }
  0x9b   :  { %v122_v9 = vpop.permute.xlu1 %121  ;;  %v129_v33 = vmax.f32 %v113_v28, %v120_v8 }
  0x9c   :  { %v130_v29 = vmax.f32 %v114_v24, %v122_v9 }
  0x9e   :  { %v134_v10 = vpop.permute.xlu0 %133 }
  0x9f   :  { %v148_v11 = vpop.permute.xlu1 %147  ;;  %v144_v30 = vmax.f32 %v128_v25, %v134_v10 }
  0xa0   :  { %v159_v22 = vmax.f32 %v143_v19, %v148_v11 }
  0xa2   :  { %v136_v12 = vpop.permute.xlu0 %135 }
  0xa3   :  { %v138_v13 = vpop.permute.xlu1 %137  ;;  %v145_v38 = vmax.f32 %v129_v33, %v136_v12 }
  0xa4   :  { %v146_v34 = vmax.f32 %v130_v29, %v138_v13 }
  0xa6   :  { %v150_v14 = vpop.permute.xlu0 %149 }
  0xa7   :  { %v164_v16 = vpop.permute.xlu1 %163  ;;  %v160_v35 = vmax.f32 %v144_v30, %v150_v14 }
  0xa8   :  { %v175_v26 = vmax.f32 %v159_v22, %v164_v16 }
  0xaa   :  { %v152_v18 = vpop.permute.xlu0 %151 }
  0xab   :  { %v154_v20 = vpop.permute.xlu1 %153  ;;  %v161_v43 = vmax.f32 %v145_v38, %v152_v18 }
  0xac   :  { %v162_v39 = vmax.f32 %v146_v34, %v154_v20 }
  0xae   :  { %v166_v23 = vpop.permute.xlu0 %165 }
  0xaf   :  { %v180_v27 = vpop.permute.xlu1 %179  ;;  %v176_v40 = vmax.f32 %v160_v35, %v166_v23 }
  0xb0   :  { %v191_v31 = vmax.f32 %v175_v26, %v180_v27 }
  0xb2   :  { %v168_v32 = vpop.permute.xlu0 %167  ;;  %v195_v36 = vsub.f32 1.0, %v191_v31 }
  0xb3   :  { %v170_v37 = vpop.permute.xlu1 %169  ;;  %v177_v47 = vmax.f32 %v161_v43, %v168_v32 }
  0xb4   :  { %v268_v41 = vpack.c.bf16 %v195_v36, %v195_v36  ;;  %v178_v44 = vmax.f32 %v162_v39, %v170_v37  ;;  %v221_v55 = vsel %vm220_vm9, %v195_v36, 0.0 }
  0xb6   :  { %v182_v42 = vpop.permute.xlu0 %181  ;;  %216 = vst.msk [vmem:[%s393_s1] sm:$0xf] %vm215_vm8, %v268_v41 }
  0xb7   :  { %v192_v45 = vmax.f32 %v176_v40, %v182_v42  ;;  %v186_v46 = vpop.permute.xlu1 %185 }
  0xb8   :  { %v194_v49 = vmax.f32 %v178_v44, %v186_v46 }
  0xb9   :  { %v196_v48 = vsub.f32 1.0, %v192_v45 }
  0xba   :  { %v184_v50 = vpop.permute.xlu0 %183  ;;  %v198_v53 = vsub.f32 1.0, %v194_v49 }
  0xbb   :  { %v269_v51 = vpack.c.bf16 %v196_v48, %v196_v48  ;;  %v222_v52 = vsel %vm220_vm9, %v196_v48, 0.0  ;;  %v193_v54 = vmax.f32 %v177_v47, %v184_v50 }
  0xbc   :  { %v271_v56 = vpack.c.bf16 %v198_v53, %v198_v53  ;;  %v223_v58 = vadd.f32 %v222_v52, %v221_v55  ;;  %v226_v62 = vsel %vm220_vm9, %v198_v53, 0.0 }
  0xbd   :  { %217 = vst.msk [vmem:[%s393_s1 + $0x4] sm:$0xf] %vm215_vm8, %v269_v51  ;;  %v197_v57 = vsub.f32 1.0, %v193_v54 }
  0xbe   :  { %219 = vst.msk [vmem:[%s393_s1 + $0xc] sm:$0xf] %vm215_vm8, %v271_v56 }
  0xbf   :  { %v270_v59 = vpack.c.bf16 %v197_v57, %v197_v57  ;;  %v224_v60 = vsel %vm220_vm9, %v197_v57, 0.0 }
  0xc0   :  { %v225_v61 = vadd.f32 %v224_v60, %v223_v58 }
  0xc1   :  { %218 = vst.msk [vmem:[%s393_s1 + $0x8] sm:$0xf] %vm215_vm8, %v270_v59  ;;  %s282_s1 = scalar_lea.vmem %s249_s7, 16 }
  0xc2   :  { %v227_v63 = vadd.f32 %v226_v62, %v225_v61  ;;  %p283_p0 = scmp.ne.s32.totalorder %s249_s7, %s282_s1  ;;  %p288_p2 = scmp.lt.s32.totalorder %s286_s9, %s282_s1 }
  0xc4   :  { %228 = vadd.xlane.f32.xlu0 %v227_v63  ;;  %p289_p3 = por %p288_p2, %p287_p1 }
  0xc6   :  { %p290_p4 = pnand %p289_p3, %p283_p0 }
 0x151   :  { %v229_v0 = vpop.xlane.xlu0 %228 }
 0x152   :  { %v230_v1 = vrot.slane %v229_v0, 4 }
 0x154   :  { %v231_v2 = vadd.f32 %v230_v1, %v229_v0 }
 0x156   :  { %v232_v3 = vrot.slane %v231_v2, 2 }
 0x158   :  { %v233_v4 = vadd.f32 %v232_v3, %v231_v2 }
 0x15a   :  { %v234_v5 = vrot.slane %v233_v4, 1 }
 0x15c   :  { %v235_v6 = vadd.f32 %v234_v5, %v233_v4 }
 0x15e   :  { %272 = vpush %v235_v6 }
 0x18f   :  { %s273_s8 = spop %272 }
 0x190   :  { %v237_v7 = vstv %s273_s8 }
 0x191   :  { %239 = vst.msk [vmem:[#allocation3] sm:$0x1] %vm238_vm10, %v237_v7 }
 0x192   :  { %293 = shalt.err (!%p290_p4)
}
 0x193   :  { %s294_s12 = scalar_lea.hbm %s394_s2, 16 }
 0x194   :  { %p295_p5 = scmp.ne.s32.totalorder %s394_s2, %s294_s12  ;;  %p298_p6 = scmp.lt.u32.totalorder %s294_s12, %s394_s2 }
 0x196   :  { %p300_p7 = pnand %p298_p6, %p295_p5 }
 0x198   :  { %303 = shalt.err (!%p300_p7)
}
 0x199   :  { %251 = dma.vmem_to_hbm [thread:$0]  %s249_s7, 16, %s394_s2, [#allocation4]  }
 0x19a   :  { %304 = dma.done.wait [#allocation4], 16  }
 0x19b   :  { %305 = vsyncadd [#allocation4], 4294967280 }
 0x19c   :  { %257 = vsyncpa [#allocation4], 1 }

</bundles_post_ra>
